<compile_context>
chip_gen: v7x
topology: tpu7x:2x2x1
jax: 0.10.0
libtpu: 0.0.40
codegen_flags: <defaults>
</compile_context>

<pallas_src>
import functools

import numpy as np
import jax
import jax.numpy as jnp
from jax.experimental import pallas as pl
from jax.experimental.pallas import tpu as pltpu


def _gridloss_kernel(theta_ref, theta_gt_ref, out_ref, *,
                     c00, c01, c02, c11, c12, c22):
    # theta_ref / theta_gt_ref: (B, 6) VMEM blocks. Widen (no-op for f32 inputs)
    # and fold the difference transform inside the kernel.
    d = theta_ref[...].astype(jnp.float32) - theta_gt_ref[...].astype(jnp.float32)

    da = d[:, 0:1]  # (B, 1)
    db = d[:, 1:2]
    dc = d[:, 2:3]
    dd = d[:, 3:4]
    de = d[:, 4:5]
    df = d[:, 5:6]

    # Per-batch quadratic form d1^T G d1 + d2^T G d2, with G (and the 1/(B*N)
    # scale, and the factor 2 on off-diagonal terms) pre-folded into the
    # compile-time constants c**.
    q = (c00 * (da * da + dd * dd)
         + c11 * (db * db + de * de)
         + c22 * (dc * dc + df * df)
         + c01 * (da * db + dd * de)
         + c02 * (da * dc + dd * df)
         + c12 * (db * dc + de * df))  # (B, 1)

    out_ref[0, 0] = jnp.sum(q)


@functools.lru_cache(maxsize=None)
def _gram_constants(grid_size: int):
    """3x3 Gram matrix of the homogeneous fixed grid [X; Y; 1] (float64) and N."""
    axis_coords = np.linspace(-1, 1, grid_size)
    Xg, Yg = np.meshgrid(axis_coords, axis_coords)
    n = grid_size * grid_size
    X = Xg.reshape(n).astype(np.float64)
    Y = Yg.reshape(n).astype(np.float64)
    g = np.array(
        [[np.dot(X, X), np.dot(X, Y), np.sum(X)],
         [np.dot(X, Y), np.dot(Y, Y), np.sum(Y)],
         [np.sum(X),    np.sum(Y),    float(n)]],
        dtype=np.float64,
    )
    return g, n


@functools.partial(jax.jit, static_argnames=("grid_size",))
def transformed_grid_loss(theta, theta_gt, grid_size: int = 20):
    """Pallas implementation of TransformedGridLoss(geometric='affine').forward."""
    batch = theta.shape[0]
    theta = theta.reshape(batch, 6)      # identity if already (B, 6)
    theta_gt = theta_gt.reshape(batch, 6)

    g, n = _gram_constants(grid_size)
    s = 1.0 / (batch * n)                # fold mean scale into the constants
    kernel = functools.partial(
        _gridloss_kernel,
        c00=float(g[0, 0] * s),
        c11=float(g[1, 1] * s),
        c22=float(g[2, 2] * s),
        c01=float(2.0 * g[0, 1] * s),
        c02=float(2.0 * g[0, 2] * s),
        c12=float(2.0 * g[1, 2] * s),
    )

    out = pl.pallas_call(
        kernel,
        out_shape=jax.ShapeDtypeStruct((1, 1), jnp.float32),
        in_specs=[
            pl.BlockSpec(memory_space=pltpu.MemorySpace.VMEM),  # theta    (B, 6)
            pl.BlockSpec(memory_space=pltpu.MemorySpace.VMEM),  # theta_GT (B, 6)
        ],
        out_specs=pl.BlockSpec(memory_space=pltpu.MemorySpace.SMEM),
    )(theta, theta_gt)
    return out[0, 0]


def _reference_loss(theta, theta_gt, grid_size: int = 20):
    """Pure-JAX reference matching the PyTorch forward exactly."""
    axis_coords = np.linspace(-1, 1, grid_size)
    Xg, Yg = np.meshgrid(axis_coords, axis_coords)
    n = grid_size * grid_size
    P = jnp.asarray(
        np.concatenate((Xg.reshape(1, n), Yg.reshape(1, n)), axis=0).astype(np.float32)
    )  # (2, N)
    B = theta.shape[0]
    Pb = jnp.broadcast_to(P, (B, 2, n))

    def aff(th):
        tm = th.reshape(B, 2, 3).astype(jnp.float32)
        return jnp.einsum("bij,bjn->bin", tm[:, :, :2], Pb) + tm[:, :, 2][:, :, None]

    pp = aff(theta)
    ppg = aff(theta_gt)
    return jnp.mean(jnp.sum((pp - ppg) ** 2, axis=1))


if __name__ == "__main__":
    key = jax.random.PRNGKey(0)
    k1, k2 = jax.random.split(key)

    batch = 4
    grid_size = 20

    # theta ~ identity affine + small perturbation; theta_GT another perturbation.
    identity = jnp.array([1.0, 0.0, 0.0, 0.0, 1.0, 0.0], dtype=jnp.float32)
    theta = identity[None, :] + 0.1 * jax.random.normal(k1, (batch, 6), dtype=jnp.float32)
    theta_gt = identity[None, :] + 0.1 * jax.random.normal(k2, (batch, 6), dtype=jnp.float32)

    loss = transformed_grid_loss(theta, theta_gt, grid_size=grid_size)
    loss = jax.block_until_ready(loss)

    ref = jax.block_until_ready(_reference_loss(theta, theta_gt, grid_size=grid_size))
    assert np.allclose(np.asarray(loss), np.asarray(ref), rtol=1e-5, atol=1e-6), (
        f"mismatch: kernel={loss} ref={ref}"
    )

    print("KERNEL_OK")
</pallas_src>

<mosaic_0001>
module attributes {stable_mosaic.version = 11 : i64} {
  func.func @_gridloss_kernel(%arg0: memref<4x6xf32, #tpu.memory_space<vmem>>, %arg1: memref<4x6xf32, #tpu.memory_space<vmem>>, %arg2: memref<1x1xf32, #tpu.memory_space<smem>>) attributes {dimension_semantics = [], scalar_prefetch = 0 : i64, scratch_operands = 0 : i64, tpu.core_type = #tpu.core_type<tc>} {
    %c0 = arith.constant 0 : index
    %c0_0 = arith.constant 0 : index
    %0 = vector.load %arg0[%c0, %c0_0] : memref<4x6xf32, #tpu.memory_space<vmem>>, vector<4x6xf32>
    %c0_1 = arith.constant 0 : index
    %c0_2 = arith.constant 0 : index
    %1 = vector.load %arg1[%c0_1, %c0_2] : memref<4x6xf32, #tpu.memory_space<vmem>>, vector<4x6xf32>
    %2 = arith.subf %0, %1 : vector<4x6xf32>
    %3 = vector.extract_strided_slice %2 {offsets = [0, 0], sizes = [4, 1], strides = [1, 1]} : vector<4x6xf32> to vector<4x1xf32>
    %4 = vector.extract_strided_slice %2 {offsets = [0, 1], sizes = [4, 1], strides = [1, 1]} : vector<4x6xf32> to vector<4x1xf32>
    %5 = vector.extract_strided_slice %2 {offsets = [0, 2], sizes = [4, 1], strides = [1, 1]} : vector<4x6xf32> to vector<4x1xf32>
    %6 = vector.extract_strided_slice %2 {offsets = [0, 3], sizes = [4, 1], strides = [1, 1]} : vector<4x6xf32> to vector<4x1xf32>
    %7 = vector.extract_strided_slice %2 {offsets = [0, 4], sizes = [4, 1], strides = [1, 1]} : vector<4x6xf32> to vector<4x1xf32>
    %8 = vector.extract_strided_slice %2 {offsets = [0, 5], sizes = [4, 1], strides = [1, 1]} : vector<4x6xf32> to vector<4x1xf32>
    %9 = arith.mulf %3, %3 : vector<4x1xf32>
    %10 = arith.mulf %6, %6 : vector<4x1xf32>
    %11 = arith.addf %9, %10 : vector<4x1xf32>
    %cst = arith.constant 0.0921052619 : f32
    %12 = vector.broadcast %cst : f32 to vector<4x1xf32>
    %13 = arith.mulf %12, %11 : vector<4x1xf32>
    %14 = arith.mulf %4, %4 : vector<4x1xf32>
    %15 = arith.mulf %7, %7 : vector<4x1xf32>
    %16 = arith.addf %14, %15 : vector<4x1xf32>
    %cst_3 = arith.constant 0.0921052619 : f32
    %17 = vector.broadcast %cst_3 : f32 to vector<4x1xf32>
    %18 = arith.mulf %17, %16 : vector<4x1xf32>
    %19 = arith.addf %13, %18 : vector<4x1xf32>
    %20 = arith.mulf %5, %5 : vector<4x1xf32>
    %21 = arith.mulf %8, %8 : vector<4x1xf32>
    %22 = arith.addf %20, %21 : vector<4x1xf32>
    %cst_4 = arith.constant 2.500000e-01 : f32
    %23 = vector.broadcast %cst_4 : f32 to vector<4x1xf32>
    %24 = arith.mulf %23, %22 : vector<4x1xf32>
    %25 = arith.addf %19, %24 : vector<4x1xf32>
    %26 = arith.mulf %3, %4 : vector<4x1xf32>
    %27 = arith.mulf %6, %7 : vector<4x1xf32>
    %28 = arith.addf %26, %27 : vector<4x1xf32>
    %cst_5 = arith.constant -9.71445151E-19 : f32
    %29 = vector.broadcast %cst_5 : f32 to vector<4x1xf32>
    %30 = arith.mulf %29, %28 : vector<4x1xf32>
    %31 = arith.addf %25, %30 : vector<4x1xf32>
    %32 = arith.mulf %3, %5 : vector<4x1xf32>
    %33 = arith.mulf %6, %8 : vector<4x1xf32>
    %34 = arith.addf %32, %33 : vector<4x1xf32>
    %cst_6 = arith.constant -2.22044608E-17 : f32
    %35 = vector.broadcast %cst_6 : f32 to vector<4x1xf32>
    %36 = arith.mulf %35, %34 : vector<4x1xf32>
    %37 = arith.addf %31, %36 : vector<4x1xf32>
    %38 = arith.mulf %4, %5 : vector<4x1xf32>
    %39 = arith.mulf %7, %8 : vector<4x1xf32>
    %40 = arith.addf %38, %39 : vector<4x1xf32>
    %cst_7 = arith.constant -3.5527136E-17 : f32
    %41 = vector.broadcast %cst_7 : f32 to vector<4x1xf32>
    %42 = arith.mulf %41, %40 : vector<4x1xf32>
    %43 = arith.addf %37, %42 : vector<4x1xf32>
    %44 = vector.shape_cast %43 : vector<4x1xf32> to vector<1x4x1xf32>
    %cst_8 = arith.constant dense<0.000000e+00> : vector<1xf32>
    %45 = vector.multi_reduction <add>, %44, %cst_8 [1, 2] : vector<1x4x1xf32> to vector<1xf32>
    %46 = vector.shape_cast %45 : vector<1xf32> to vector<1x1x1xf32>
    %47 = vector.extract %46[0, 0, 0] : f32 from vector<1x1x1xf32>
    %c0_9 = arith.constant 0 : index
    %c0_10 = arith.constant 0 : index
    %48 = memref.load %arg2[%c0_9, %c0_10] : memref<1x1xf32, #tpu.memory_space<smem>>
    memref.store %47, %arg2[%c0_9, %c0_10] : memref<1x1xf32, #tpu.memory_space<smem>>
    return
  }
}

</mosaic_0001>

<bundles_post_ra>
// kernel: transformed_grid_loss.1
= control target key start
LH: loop header
LB: loop body
LE: loop exit
PB: predicated region body
PF: predicated region fallthrough
CT: control target
= control target key end

     0   :  { %7 = vsyncpa [#allocation3], 0  ;;  %s239_s0 = inlined_call_operand.hbm [shape: f32[4,6], index: 0, kind: input, shape index: {}]   ;;  %s240_s1 = inlined_call_operand.hbm [shape: f32[4,6], index: 1, kind: input, shape index: {}]   ;;  %s241_s2 = inlined_call_operand.hbm [shape: f32[1,1], index: 2, kind: output, shape index: {}]  }
   0x1   :  { %8 = vsyncpa [#allocation6], 0 }
   0x2   :  { %9 = vsyncpa [#allocation4], 0  ;;  %s182_s9 = smov [#allocation2]   ;;  %s183_s11 = smov [#allocation5]  }
   0x3   :  { %s16_s10 = sshll.u32 %s182_s9, 4  ;;  %s26_s12 = sshll.u32 %s183_s11, 4  ;;  %s17_s10 = int_to_ptr.vmem [resolvable:$true] %s16_s10  ;;  %s27_s12 = int_to_ptr.vmem [resolvable:$true] %s26_s12 }
   0x4   :  { %s122_s15 = scalar_lea.hbm %s239_s0, 64 }
   0x5   :  { %p123_p0 = scmp.ne.s32.totalorder %s239_s0, %s122_s15  ;;  %p126_p1 = scmp.lt.u32.totalorder %s122_s15, %s239_s0 }
   0x7   :  { %p128_p2 = pnand %p126_p1, %p123_p0 }
   0x9   :  { %131 = shalt.err (!%p128_p2)
}
   0xa   :  { %s132_s20 = scalar_lea.vmem %s17_s10, 64  ;;  %p137_p4 = scmp.lt.s32.totalorder %s17_s10, %s17_s10 }
   0xb   :  { %p133_p3 = scmp.ne.s32.totalorder %s17_s10, %s132_s20  ;;  %p138_p5 = scmp.lt.s32.totalorder %s132_s20, %s132_s20 }
   0xd   :  { %p139_p6 = por %p138_p5, %p137_p4 }
   0xf   :  { %p140_p7 = pnand %p139_p6, %p133_p3 }
  0x11   :  { %143 = shalt.err (!%p140_p7)
}
  0x12   :  { %19 = dma.hbm_to_vmem [thread:$0]  %s239_s0, 64, %s17_s10, [#allocation3]  }
  0x13   :  { %s144_s25 = scalar_lea.hbm %s240_s1, 64 }
  0x14   :  { %p145_p8 = scmp.ne.s32.totalorder %s240_s1, %s144_s25  ;;  %p148_p9 = scmp.lt.u32.totalorder %s144_s25, %s240_s1 }
  0x16   :  { %p150_p10 = pnand %p148_p9, %p145_p8 }
  0x18   :  { %153 = shalt.err (!%p150_p10)
}
  0x19   :  { %s154_s30 = scalar_lea.vmem %s27_s12, 64  ;;  %p159_p12 = scmp.lt.s32.totalorder %s27_s12, %s27_s12 }
  0x1a   :  { %p155_p11 = scmp.ne.s32.totalorder %s27_s12, %s154_s30  ;;  %p160_p13 = scmp.lt.s32.totalorder %s154_s30, %s154_s30 }
  0x1c   :  { %p161_p0 = por %p160_p13, %p159_p12 }
  0x1e   :  { %p162_p1 = pnand %p161_p0, %p155_p11 }
  0x20   :  { %165 = shalt.err (!%p162_p1)
}
  0x21   :  { %29 = dma.hbm_to_vmem [thread:$0]  %s240_s1, 64, %s27_s12, [#allocation6]  }
  0x22   :  { %176 = dma.done.wait [#allocation3], 64  }
  0x23   :  { %177 = vsyncadd [#allocation3], 4294967232 }
  0x24   :  { %178 = dma.done.wait [#allocation6], 64  }
  0x25   :  { %179 = vsyncadd [#allocation6], 4294967232  ;;  %v36_v0 = vld [vmem:[#allocation2] sm:$0xf]  ;;  %v37_v1 = vld [vmem:[#allocation5] sm:$0xf] }
  0x26   :  { %v38_v2 = vsub.f32 %v36_v0, %v37_v1  ;;  %s184_s4 = smov 127   ;;  %s185_s5 = smov 126   ;;  %vm86_vm0 = vcmask 3072  }
  0x27   :  { %s186_s6 = smov 125   ;;  %s166_s9 = scalar_lea.hbm %s241_s2, 16 }
  0x28   :  { %58 = vrot.lane.b32.xlu0 %v38_v2, %s184_s4  ;;  %v39_v3 = vmul.f32 %v38_v2, %v38_v2  ;;  %69 = vrot.lane.b32.xlu1 %v38_v2, %s185_s5  ;;  %p167_p2 = scmp.ne.s32.totalorder %s241_s2, %s166_s9  ;;  %p170_p3 = scmp.lt.u32.totalorder %s166_s9, %s241_s2 }
  0x2a   :  { %p172_p4 = pnand %p170_p3, %p167_p2 }
  0x2c   :  { %41 = vrot.lane.b32.xlu0 %v39_v3, %s186_s6 }
  0x9a   :  { %v59_v4 = vpop.permute.xlu0 %58  ;;  %v70_v8 = vpop.permute.xlu1 %69 }
  0x9b   :  { %v61_v5 = vmul.f32 %v59_v4, %v38_v2  ;;  %v72_v11 = vmul.f32 %v70_v8, %v38_v2 }
  0x9d   :  { %63 = vrot.lane.b32.xlu1 %v61_v5, %s186_s6 }
  0x9e   :  { %v42_v6 = vpop.permute.xlu0 %41 }
  0x9f   :  { %v44_v7 = vadd.f32 %v42_v6, %v39_v3 }
  0xa1   :  { %v45_v9 = vmul.f32 0.09210526, %v44_v7  ;;  %v51_v10 = vmul.f32 0.25, %v44_v7 }
  0xa3   :  { %47 = vrot.lane.b32.xlu0 %v45_v9, %s184_s4  ;;  %53 = vrot.lane.b32.xlu1 %v51_v10, %s185_s5 }
  0xa7   :  { %74 = vrot.lane.b32.xlu0 %v72_v11, %s186_s6 }
 0x10f   :  { %v64_v12 = vpop.permute.xlu1 %63 }
 0x110   :  { %v66_v13 = vadd.f32 %v64_v12, %v61_v5 }
 0x112   :  { %v80_v14 = vmul.f32 -3.5527136e-17, %v66_v13  ;;  %v67_v21 = vmul.f32 -9.714452e-19, %v66_v13 }
 0x114   :  { %82 = vrot.lane.b32.xlu1 %v80_v14, %s184_s4 }
 0x115   :  { %v48_v15 = vpop.permute.xlu0 %47  ;;  %v54_v18 = vpop.permute.xlu1 %53 }
 0x116   :  { %v50_v17 = vadd.f32 %v48_v15, %v45_v9 }
 0x118   :  { %v56_v20 = vadd.f32 %v54_v18, %v50_v17 }
 0x119   :  { %v75_v16 = vpop.permute.xlu0 %74 }
 0x11a   :  { %v77_v19 = vadd.f32 %v75_v16, %v72_v11  ;;  %v68_v23 = vadd.f32 %v67_v21, %v56_v20 }
 0x11c   :  { %v78_v22 = vmul.f32 -2.220446e-17, %v77_v19 }
 0x11e   :  { %v79_v24 = vadd.f32 %v78_v22, %v68_v23 }
 0x186   :  { %v83_v25 = vpop.permute.xlu1 %82 }
 0x187   :  { %v85_v26 = vadd.f32 %v83_v25, %v79_v24 }
 0x189   :  { %v87_v27 = vsel %vm86_vm0, %v85_v26, 0.0 }
 0x18a   :  { %88 = vadd.xlane.f32.xlu0 %v87_v27 }
 0x217   :  { %v89_v28 = vpop.xlane.xlu0 %88 }
 0x218   :  { %v90_v29 = vrot.slane %v89_v28, 4 }
 0x21a   :  { %v91_v30 = vadd.f32 %v90_v29, %v89_v28 }
 0x21c   :  { %v92_v31 = vrot.slane %v91_v30, 2 }
 0x21e   :  { %v93_v32 = vadd.f32 %v92_v31, %v91_v30 }
 0x220   :  { %v94_v33 = vrot.slane %v93_v32, 1 }
 0x222   :  { %v95_v34 = vadd.f32 %v94_v33, %v93_v32 }
 0x224   :  { %114 = vpush %v95_v34 }
 0x255   :  { %s115_s1 = spop %114 }
 0x256   :  { %98 = sst [smem:[#allocation7]] %s115_s1 }
 0x257   :  { %175 = shalt.err (!%p172_p4)
}
 0x258   :  { %s187_s14 = smov [#allocation7]  }
 0x259   :  { %106 = dma.smem_to_hbm %s187_s14, 16, %s241_s2, [#allocation4]  }
 0x25a   :  { %180 = dma.done.wait [#allocation4], 16  }
 0x25b   :  { %181 = vsyncadd [#allocation4], 4294967280 }
 0x25c   :  { %110 = sfence }
 0x25d   :  { %111 = vsyncpa [#allocation3], 1 }
 0x25e   :  { %112 = vsyncpa [#allocation6], 1 }
 0x25f   :  { %113 = vsyncpa [#allocation4], 1 }

</bundles_post_ra>
